<compile_context>
chip_gen: v6e
topology: v6e:2x2x1
jax: 0.10.0
libtpu: 0.0.40
codegen_flags: <defaults>
</compile_context>

<pallas_src>
import functools
import numpy as np
import jax
import jax.numpy as jnp
from jax import lax
from jax.experimental import pallas as pl
from jax.experimental.pallas import tpu as pltpu


# ---------------------------------------------------------------------------
# Model hyper-parameters (consistent with RaiFlowFeedForward.__init__)
# ---------------------------------------------------------------------------
DIM = 32
NUM_HEADS = 4
HEAD_DIM = 8
HEADS_PER_GROUP = 2
ROUTER_MULT = 2
FF_MULT = 2

NUM_GROUPS = NUM_HEADS // HEADS_PER_GROUP                                # 2
INNER_DIM = int(NUM_GROUPS * HEAD_DIM * HEADS_PER_GROUP * ROUTER_MULT)  # 64
FF_DIM = int(INNER_DIM * FF_MULT)                                       # 128

BATCH = 2
SEQ = 16

SUBLANE_BF16 = 16


def _ceil_to(n, m):
    return ((n + m - 1) // m) * m


def _gelu_tanh(x):
    # matches torch.nn.GELU(approximate='tanh')
    return jax.nn.gelu(x, approximate=True)


# ---------------------------------------------------------------------------
# Pallas kernel: whole (B*S)-row problem in a single invocation (no grid)
# ---------------------------------------------------------------------------
def _ff_block_kernel(x_ref, alpha_ref, dytw_ref, dytb_ref,
                     wr_ref, br_ref, w1_ref, b1_ref, w2_ref, b2_ref,
                     wp_ref, bp_ref, scale_ref, shift_ref, o_ref, *, seq):
    bs = x_ref.shape[0]
    cdt = wr_ref.dtype                      # bf16 operand dtype for the MXU

    # Per-sequence boundary masks: built ONCE and reused for both convs.
    # Requires rows to be laid out as B contiguous blocks of exactly `seq`
    # rows (bs % seq == 0, asserted in the wrapper); padded tail rows can
    # never leak into real rows because the last row of every sequence is
    # `not_last`-masked and row 0 is `not_first`-masked.
    row = lax.broadcasted_iota(jnp.int32, (bs, 1), 0)
    pos = row % seq
    not_first = pos != 0                    # predecessor row is in-sequence
    not_last = pos != (seq - 1)             # successor row is in-sequence

    def taps(v):
        # v: f32 (bs, C) -> bf16 (v[i-1], v[i+1]) with zeros at sequence
        # boundaries (also blocks cross-batch / padded-tail leakage).
        # Rolls/selects kept in f32 for portability (v5e has no bf16 VPU).
        v_m1 = jnp.where(not_first, pltpu.roll(v, shift=1, axis=0), 0.0)
        v_p1 = jnp.where(not_last, pltpu.roll(v, shift=bs - 1, axis=0), 0.0)
        return v_m1.astype(cdt), v_p1.astype(cdt)

    xf = x_ref[...].astype(jnp.float32)                         # (bs, dim) f32

    # ---- DynamicTanh (norm_ff): w * tanh(alpha * x) + b --------------------
    alpha = alpha_ref[0, 0]
    n = dytw_ref[...] * jnp.tanh(alpha * xf) + dytb_ref[...]

    # ---- router: Linear + GELU(tanh)  (Dropout = identity in eval) --------
    r = jnp.dot(n.astype(cdt), wr_ref[...],
                preferred_element_type=jnp.float32) + br_ref[...]
    r = _gelu_tanh(r)                                           # (bs, inner) f32
    r_c = r.astype(cdt)

    # ---- conv1: grouped Conv1d(inner -> ff, k=3, pad=1) as 3 tap matmuls ---
    r_m1, r_p1 = taps(r)
    h = (jnp.dot(r_m1, w1_ref[0], preferred_element_type=jnp.float32)
         + jnp.dot(r_c, w1_ref[1], preferred_element_type=jnp.float32)
         + jnp.dot(r_p1, w1_ref[2], preferred_element_type=jnp.float32)
         + b1_ref[...])
    h = _gelu_tanh(h)                                           # (bs, ff) f32
    h_c = h.astype(cdt)

    # ---- conv2: grouped Conv1d(ff -> inner, k=3, pad=1) as 3 tap matmuls ---
    h_m1, h_p1 = taps(h)
    y = (jnp.dot(h_m1, w2_ref[0], preferred_element_type=jnp.float32)
         + jnp.dot(h_c, w2_ref[1], preferred_element_type=jnp.float32)
         + jnp.dot(h_p1, w2_ref[2], preferred_element_type=jnp.float32)
         + b2_ref[...])                                         # (bs, inner) f32

    # ---- inner residual + proj_out -----------------------------------------
    y = _gelu_tanh(y + r)
    ff = jnp.dot(y.astype(cdt), wp_ref[...],
                 preferred_element_type=jnp.float32) + bp_ref[...]  # (bs, dim)

    # ---- addcmul(shift_ff, ff, scale_ff) + outer residual ------------------
    out = xf + (shift_ref[...] + ff * scale_ref[...])
    o_ref[...] = out.astype(o_ref.dtype)


@jax.jit
def raiflow_ff_block(x, params):
    """FF half of RaiFlowSingleTransformerBlock (is_2d=False):
       x + addcmul(shift_ff, RaiFlowFeedForward(DynamicTanh(x)), scale_ff)."""
    B, S, dim = x.shape
    bs = B * S
    assert bs % S == 0  # boundary-mask scheme requires contiguous sequences
    bs_p = _ceil_to(bs, SUBLANE_BF16)

    (alpha, dytw, dytb, wr_t, br, w1s, b1, w2s, b2, wp_t, bp,
     scale_ff, shift_ff) = params

    # bf16 input slab; only the row count is padded (K dims stay natural).
    x2 = jnp.pad(x.reshape(bs, dim).astype(jnp.bfloat16),
                 ((0, bs_p - bs), (0, 0)))

    vmem = pl.BlockSpec(memory_space=pltpu.MemorySpace.VMEM)
    smem = pl.BlockSpec(memory_space=pltpu.MemorySpace.SMEM)

    out = pl.pallas_call(
        functools.partial(_ff_block_kernel, seq=S),
        out_shape=jax.ShapeDtypeStruct((bs_p, dim), jnp.bfloat16),
        # No grid: single invocation, whole arrays resident in VMEM/SMEM
        # (single-buffered — nothing to pipeline, so no 2x weight buffers).
        in_specs=[vmem, smem] + [vmem] * 12,
        out_specs=vmem,
    )(x2, alpha, dytw, dytb, wr_t, br, w1s, b1, w2s, b2, wp_t, bp,
      scale_ff, shift_ff)

    return out[:bs].astype(jnp.float32).reshape(B, S, dim)


# ---------------------------------------------------------------------------
# Parameter construction (deterministic) + packing for the fused kernel
# ---------------------------------------------------------------------------
def make_params(key):
    ks = jax.random.split(key, 12)
    s = 0.05
    alpha = jnp.float32(0.2)                                     # DynamicTanh init_alpha
    dytw = 1.0 + s * jax.random.normal(ks[0], (DIM,), jnp.float32)
    dytb = s * jax.random.normal(ks[1], (DIM,), jnp.float32)
    # Router Linear(dim, inner): torch weight (inner, dim), bias (inner,)
    wr = s * jax.random.normal(ks[2], (INNER_DIM, DIM), jnp.float32)
    br = s * jax.random.normal(ks[3], (INNER_DIM,), jnp.float32)
    # Conv1d(inner -> ff, k=3, groups=G): weight (ff, inner/G, 3)
    w1 = s * jax.random.normal(ks[4], (FF_DIM, INNER_DIM // NUM_GROUPS, 3),
                               jnp.float32)
    b1 = s * jax.random.normal(ks[5], (FF_DIM,), jnp.float32)
    # Conv1d(ff -> inner, k=3, groups=G): weight (inner, ff/G, 3)
    w2 = s * jax.random.normal(ks[6], (INNER_DIM, FF_DIM // NUM_GROUPS, 3),
                               jnp.float32)
    b2 = s * jax.random.normal(ks[7], (INNER_DIM,), jnp.float32)
    # proj_out Linear(inner, dim): weight (dim, inner), bias (dim,)
    wp = s * jax.random.normal(ks[8], (DIM, INNER_DIM), jnp.float32)
    bp = s * jax.random.normal(ks[9], (DIM,), jnp.float32)
    scale_ff = 1.0 + s * jax.random.normal(ks[10], (DIM,), jnp.float32)
    shift_ff = s * jax.random.normal(ks[11], (DIM,), jnp.float32)
    return (alpha, dytw, dytb, wr, br, w1, b1, w2, b2, wp, bp,
            scale_ff, shift_ff)


def _densify_grouped_conv(w, cin, cout, groups):
    """Torch grouped-conv weight (cout, cin/g, 3) -> per-tap dense slab
    (3, cin, cout) with block-diagonal group structure, so that the conv is
    sum_k shifted_input_k @ slab[k].

    Crossover rule: keep this dense block-diagonal form while channels/group
    is < 128 (here 32 / 64) — per-group matmuls would badly underfill the
    256-wide v6e/v7x MXU; switch to per-group matmuls only when channels/group
    >= 128 or the structural-zero fraction exceeds ~4x (groups > 4)."""
    w = np.asarray(w)
    cin_g, cout_g = cin // groups, cout // groups
    dense = np.zeros((3, cin, cout), np.float32)
    for g in range(groups):
        blk = w[g * cout_g:(g + 1) * cout_g]              # (cout_g, cin_g, 3)
        dense[:, g * cin_g:(g + 1) * cin_g,
              g * cout_g:(g + 1) * cout_g] = np.transpose(blk, (2, 1, 0))
    return dense


def pack_params(raw, compute_dtype=jnp.bfloat16):
    (alpha, dytw, dytb, wr, br, w1, b1, w2, b2, wp, bp,
     scale_ff, shift_ff) = raw
    # Contraction (K) dims stay natural (32 / 64 / 128 — all multiples of the
    # bf16 sublane pack of 16); no padding of K or N to 128.
    wr_t = jnp.asarray(np.asarray(wr).T, compute_dtype)               # (32, 64)
    w1s = jnp.asarray(_densify_grouped_conv(w1, INNER_DIM, FF_DIM, NUM_GROUPS),
                      compute_dtype)                                  # (3, 64, 128)
    w2s = jnp.asarray(_densify_grouped_conv(w2, FF_DIM, INNER_DIM, NUM_GROUPS),
                      compute_dtype)                                  # (3, 128, 64)
    wp_t = jnp.asarray(np.asarray(wp).T, compute_dtype)               # (64, 32)

    row = lambda v: jnp.asarray(np.asarray(v)[None, :], jnp.float32)  # (1, C) f32
    return (jnp.full((1, 1), alpha, jnp.float32),
            row(dytw), row(dytb),
            wr_t, row(br), w1s, row(b1), w2s, row(b2), wp_t, row(bp),
            row(scale_ff), row(shift_ff))


# ---------------------------------------------------------------------------
# Pure-JAX reference (original grouped-conv weights, full f32)
# ---------------------------------------------------------------------------
def reference(x, raw):
    (alpha, dytw, dytb, wr, br, w1, b1, w2, b2, wp, bp,
     scale_ff, shift_ff) = raw
    n = dytw * jnp.tanh(alpha * x) + dytb                         # DynamicTanh
    r = _gelu_tanh(jnp.einsum('bsd,od->bso', n, wr) + br)         # (B,S,inner)
    hc = jnp.transpose(r, (0, 2, 1))                              # (B,inner,S)
    dn = ('NCH', 'OIH', 'NCH')
    h1 = lax.conv_general_dilated(hc, w1, (1,), ((1, 1),),
                                  dimension_numbers=dn,
                                  feature_group_count=NUM_GROUPS)
    h1 = _gelu_tanh(h1 + b1[None, :, None])
    h2 = lax.conv_general_dilated(h1, w2, (1,), ((1, 1),),
                                  dimension_numbers=dn,
                                  feature_group_count=NUM_GROUPS)
    h2 = h2 + b2[None, :, None]
    y = _gelu_tanh(jnp.transpose(h2, (0, 2, 1)) + r)
    ff = jnp.einsum('bsi,oi->bso', y, wp) + bp
    return x + (shift_ff + ff * scale_ff)


# ---------------------------------------------------------------------------
if __name__ == "__main__":
    key = jax.random.PRNGKey(0)
    k_x, k_p = jax.random.split(key)
    x = jax.random.normal(k_x, (BATCH, SEQ, DIM), jnp.float32)

    raw_params = make_params(k_p)
    params = pack_params(raw_params)

    out = jax.block_until_ready(raiflow_ff_block(x, params))
    ref = jax.block_until_ready(reference(x, raw_params))

    assert out.shape == (BATCH, SEQ, DIM)
    np.testing.assert_allclose(np.asarray(out), np.asarray(ref),
                               rtol=2e-2, atol=2e-2)
    print("KERNEL_OK")
</pallas_src>

<mosaic_0001>
module attributes {stable_mosaic.version = 11 : i64} {
  func.func @_ff_block_kernel(%arg0: memref<32x32xbf16, #tpu.memory_space<vmem>>, %arg1: memref<1x1xf32, #tpu.memory_space<smem>>, %arg2: memref<1x32xf32, #tpu.memory_space<vmem>>, %arg3: memref<1x32xf32, #tpu.memory_space<vmem>>, %arg4: memref<32x64xbf16, #tpu.memory_space<vmem>>, %arg5: memref<1x64xf32, #tpu.memory_space<vmem>>, %arg6: memref<3x64x128xbf16, #tpu.memory_space<vmem>>, %arg7: memref<1x128xf32, #tpu.memory_space<vmem>>, %arg8: memref<3x128x64xbf16, #tpu.memory_space<vmem>>, %arg9: memref<1x64xf32, #tpu.memory_space<vmem>>, %arg10: memref<64x32xbf16, #tpu.memory_space<vmem>>, %arg11: memref<1x32xf32, #tpu.memory_space<vmem>>, %arg12: memref<1x32xf32, #tpu.memory_space<vmem>>, %arg13: memref<1x32xf32, #tpu.memory_space<vmem>>, %arg14: memref<32x32xbf16, #tpu.memory_space<vmem>>) attributes {dimension_semantics = [], scalar_prefetch = 0 : i64, scratch_operands = 0 : i64, tpu.core_type = #tpu.core_type<tc>} {
    %0 = tpu.iota {dimensions = array<i32: 0>} : vector<32x1xi32>
    %c16_i32 = arith.constant 16 : i32
    %c0_i32 = arith.constant 0 : i32
    %1 = arith.cmpi eq, %c16_i32, %c0_i32 : i32
    %c1_i32 = arith.constant 1 : i32
    %2 = arith.select %1, %c1_i32, %c16_i32 : i32
    %3 = vector.broadcast %2 : i32 to vector<32x1xi32>
    %4 = arith.remsi %0, %3 : vector<32x1xi32>
    %c0_i32_0 = arith.constant 0 : i32
    %5 = vector.broadcast %c0_i32_0 : i32 to vector<32x1xi32>
    %6 = arith.cmpi ne, %4, %5 : vector<32x1xi32>
    %c0_i32_1 = arith.constant 0 : i32
    %7 = vector.broadcast %c0_i32_1 : i32 to vector<32x1xi32>
    %8 = arith.cmpi slt, %4, %7 : vector<32x1xi32>
    %c0_i32_2 = arith.constant 0 : i32
    %9 = arith.cmpi slt, %2, %c0_i32_2 : i32
    %10 = vector.broadcast %9 : i1 to vector<32x1xi1>
    %11 = vector.broadcast %10 : vector<32x1xi1> to vector<32x1xi1>
    %12 = arith.xori %8, %11 : vector<32x1xi1>
    %13 = arith.andi %12, %6 : vector<32x1xi1>
    %14 = vector.broadcast %2 : i32 to vector<32x1xi32>
    %15 = arith.addi %4, %14 : vector<32x1xi32>
    %16 = arith.select %13, %15, %4 : vector<32x1xi1>, vector<32x1xi32>
    %c0_i32_3 = arith.constant 0 : i32
    %17 = vector.broadcast %c0_i32_3 : i32 to vector<32x1xi32>
    %18 = arith.cmpi ne, %16, %17 : vector<32x1xi32>
    %c15_i32 = arith.constant 15 : i32
    %19 = vector.broadcast %c15_i32 : i32 to vector<32x1xi32>
    %20 = arith.cmpi ne, %16, %19 : vector<32x1xi32>
    %c0 = arith.constant 0 : index
    %c0_4 = arith.constant 0 : index
    %21 = vector.load %arg0[%c0, %c0_4] : memref<32x32xbf16, #tpu.memory_space<vmem>>, vector<32x32xbf16>
    %22 = arith.extf %21 : vector<32x32xbf16> to vector<32x32xf32>
    %c0_5 = arith.constant 0 : index
    %c0_6 = arith.constant 0 : index
    %23 = memref.load %arg1[%c0_5, %c0_6] : memref<1x1xf32, #tpu.memory_space<smem>>
    %c0_7 = arith.constant 0 : index
    %c0_8 = arith.constant 0 : index
    %24 = vector.load %arg2[%c0_7, %c0_8] : memref<1x32xf32, #tpu.memory_space<vmem>>, vector<1x32xf32>
    %25 = vector.broadcast %23 : f32 to vector<32x32xf32>
    %26 = arith.mulf %25, %22 : vector<32x32xf32>
    %27 = math.tanh %26 : vector<32x32xf32>
    %28 = vector.broadcast %24 : vector<1x32xf32> to vector<32x32xf32>
    %29 = arith.mulf %28, %27 : vector<32x32xf32>
    %c0_9 = arith.constant 0 : index
    %c0_10 = arith.constant 0 : index
    %30 = vector.load %arg3[%c0_9, %c0_10] : memref<1x32xf32, #tpu.memory_space<vmem>>, vector<1x32xf32>
    %31 = vector.broadcast %30 : vector<1x32xf32> to vector<32x32xf32>
    %32 = arith.addf %29, %31 : vector<32x32xf32>
    %33 = arith.truncf %32 : vector<32x32xf32> to vector<32x32xbf16>
    %c0_11 = arith.constant 0 : index
    %c0_12 = arith.constant 0 : index
    %34 = vector.load %arg4[%c0_11, %c0_12] : memref<32x64xbf16, #tpu.memory_space<vmem>>, vector<32x64xbf16>
    %cst = arith.constant dense<0.000000e+00> : vector<32x64xf32>
    %35 = tpu.matmul %33, %34, %cst {dimension_numbers = #tpu.dot_dimension_numbers<[1], [0], [0], [1], [0, 0, 1, 1], [], []>} : vector<32x32xbf16>, vector<32x64xbf16>, vector<32x64xf32> -> vector<32x64xf32>
    %c0_13 = arith.constant 0 : index
    %c0_14 = arith.constant 0 : index
    %36 = vector.load %arg5[%c0_13, %c0_14] : memref<1x64xf32, #tpu.memory_space<vmem>>, vector<1x64xf32>
    %37 = vector.broadcast %36 : vector<1x64xf32> to vector<32x64xf32>
    %38 = arith.addf %35, %37 : vector<32x64xf32>
    %39 = arith.mulf %38, %38 : vector<32x64xf32>
    %40 = arith.mulf %38, %39 : vector<32x64xf32>
    %cst_15 = arith.constant 4.471500e-02 : f32
    %41 = vector.broadcast %cst_15 : f32 to vector<32x64xf32>
    %42 = arith.mulf %41, %40 : vector<32x64xf32>
    %43 = arith.addf %38, %42 : vector<32x64xf32>
    %cst_16 = arith.constant 0.797884583 : f32
    %44 = vector.broadcast %cst_16 : f32 to vector<32x64xf32>
    %45 = arith.mulf %44, %43 : vector<32x64xf32>
    %46 = math.tanh %45 : vector<32x64xf32>
    %cst_17 = arith.constant 1.000000e+00 : f32
    %47 = vector.broadcast %cst_17 : f32 to vector<32x64xf32>
    %48 = arith.addf %47, %46 : vector<32x64xf32>
    %cst_18 = arith.constant 5.000000e-01 : f32
    %49 = vector.broadcast %cst_18 : f32 to vector<32x64xf32>
    %50 = arith.mulf %49, %48 : vector<32x64xf32>
    %51 = arith.mulf %38, %50 : vector<32x64xf32>
    %52 = arith.truncf %51 : vector<32x64xf32> to vector<32x64xbf16>
    %c1_i32_19 = arith.constant 1 : i32
    %53 = tpu.dynamic_rotate %51 by %c1_i32_19 dim 0 : vector<32x64xf32>, i32 -> vector<32x64xf32>
    %cst_20 = arith.constant 0.000000e+00 : f32
    %54 = vector.shape_cast %18 : vector<32x1xi1> to vector<32x1xi1>
    %55 = vector.broadcast %54 : vector<32x1xi1> to vector<32x64xi1>
    %56 = vector.broadcast %cst_20 : f32 to vector<32x64xf32>
    %57 = arith.select %55, %53, %56 : vector<32x64xi1>, vector<32x64xf32>
    %c31_i32 = arith.constant 31 : i32
    %58 = tpu.dynamic_rotate %51 by %c31_i32 dim 0 : vector<32x64xf32>, i32 -> vector<32x64xf32>
    %cst_21 = arith.constant 0.000000e+00 : f32
    %59 = vector.shape_cast %20 : vector<32x1xi1> to vector<32x1xi1>
    %60 = vector.broadcast %59 : vector<32x1xi1> to vector<32x64xi1>
    %61 = vector.broadcast %cst_21 : f32 to vector<32x64xf32>
    %62 = arith.select %60, %58, %61 : vector<32x64xi1>, vector<32x64xf32>
    %63 = arith.truncf %57 : vector<32x64xf32> to vector<32x64xbf16>
    %64 = arith.truncf %62 : vector<32x64xf32> to vector<32x64xbf16>
    %c0_22 = arith.constant 0 : index
    %c0_23 = arith.constant 0 : index
    %c0_24 = arith.constant 0 : index
    %65 = vector.load %arg6[%c0_22, %c0_23, %c0_24] : memref<3x64x128xbf16, #tpu.memory_space<vmem>>, vector<1x64x128xbf16>
    %66 = vector.shape_cast %65 : vector<1x64x128xbf16> to vector<64x128xbf16>
    %cst_25 = arith.constant dense<0.000000e+00> : vector<32x128xf32>
    %67 = tpu.matmul %63, %66, %cst_25 {dimension_numbers = #tpu.dot_dimension_numbers<[1], [0], [0], [1], [0, 0, 1, 1], [], []>} : vector<32x64xbf16>, vector<64x128xbf16>, vector<32x128xf32> -> vector<32x128xf32>
    %c1 = arith.constant 1 : index
    %c0_26 = arith.constant 0 : index
    %c0_27 = arith.constant 0 : index
    %68 = vector.load %arg6[%c1, %c0_26, %c0_27] : memref<3x64x128xbf16, #tpu.memory_space<vmem>>, vector<1x64x128xbf16>
    %69 = vector.shape_cast %68 : vector<1x64x128xbf16> to vector<64x128xbf16>
    %cst_28 = arith.constant dense<0.000000e+00> : vector<32x128xf32>
    %70 = tpu.matmul %52, %69, %cst_28 {dimension_numbers = #tpu.dot_dimension_numbers<[1], [0], [0], [1], [0, 0, 1, 1], [], []>} : vector<32x64xbf16>, vector<64x128xbf16>, vector<32x128xf32> -> vector<32x128xf32>
    %71 = arith.addf %67, %70 : vector<32x128xf32>
    %c2 = arith.constant 2 : index
    %c0_29 = arith.constant 0 : index
    %c0_30 = arith.constant 0 : index
    %72 = vector.load %arg6[%c2, %c0_29, %c0_30] : memref<3x64x128xbf16, #tpu.memory_space<vmem>>, vector<1x64x128xbf16>
    %73 = vector.shape_cast %72 : vector<1x64x128xbf16> to vector<64x128xbf16>
    %cst_31 = arith.constant dense<0.000000e+00> : vector<32x128xf32>
    %74 = tpu.matmul %64, %73, %cst_31 {dimension_numbers = #tpu.dot_dimension_numbers<[1], [0], [0], [1], [0, 0, 1, 1], [], []>} : vector<32x64xbf16>, vector<64x128xbf16>, vector<32x128xf32> -> vector<32x128xf32>
    %75 = arith.addf %71, %74 : vector<32x128xf32>
    %c0_32 = arith.constant 0 : index
    %c0_33 = arith.constant 0 : index
    %76 = vector.load %arg7[%c0_32, %c0_33] : memref<1x128xf32, #tpu.memory_space<vmem>>, vector<1x128xf32>
    %77 = vector.broadcast %76 : vector<1x128xf32> to vector<32x128xf32>
    %78 = arith.addf %75, %77 : vector<32x128xf32>
    %79 = arith.mulf %78, %78 : vector<32x128xf32>
    %80 = arith.mulf %78, %79 : vector<32x128xf32>
    %cst_34 = arith.constant 4.471500e-02 : f32
    %81 = vector.broadcast %cst_34 : f32 to vector<32x128xf32>
    %82 = arith.mulf %81, %80 : vector<32x128xf32>
    %83 = arith.addf %78, %82 : vector<32x128xf32>
    %cst_35 = arith.constant 0.797884583 : f32
    %84 = vector.broadcast %cst_35 : f32 to vector<32x128xf32>
    %85 = arith.mulf %84, %83 : vector<32x128xf32>
    %86 = math.tanh %85 : vector<32x128xf32>
    %cst_36 = arith.constant 1.000000e+00 : f32
    %87 = vector.broadcast %cst_36 : f32 to vector<32x128xf32>
    %88 = arith.addf %87, %86 : vector<32x128xf32>
    %cst_37 = arith.constant 5.000000e-01 : f32
    %89 = vector.broadcast %cst_37 : f32 to vector<32x128xf32>
    %90 = arith.mulf %89, %88 : vector<32x128xf32>
    %91 = arith.mulf %78, %90 : vector<32x128xf32>
    %92 = arith.truncf %91 : vector<32x128xf32> to vector<32x128xbf16>
    %c1_i32_38 = arith.constant 1 : i32
    %93 = tpu.dynamic_rotate %91 by %c1_i32_38 dim 0 : vector<32x128xf32>, i32 -> vector<32x128xf32>
    %cst_39 = arith.constant 0.000000e+00 : f32
    %94 = vector.shape_cast %18 : vector<32x1xi1> to vector<32x1xi1>
    %95 = vector.broadcast %94 : vector<32x1xi1> to vector<32x128xi1>
    %96 = vector.broadcast %cst_39 : f32 to vector<32x128xf32>
    %97 = arith.select %95, %93, %96 : vector<32x128xi1>, vector<32x128xf32>
    %c31_i32_40 = arith.constant 31 : i32
    %98 = tpu.dynamic_rotate %91 by %c31_i32_40 dim 0 : vector<32x128xf32>, i32 -> vector<32x128xf32>
    %cst_41 = arith.constant 0.000000e+00 : f32
    %99 = vector.shape_cast %20 : vector<32x1xi1> to vector<32x1xi1>
    %100 = vector.broadcast %99 : vector<32x1xi1> to vector<32x128xi1>
    %101 = vector.broadcast %cst_41 : f32 to vector<32x128xf32>
    %102 = arith.select %100, %98, %101 : vector<32x128xi1>, vector<32x128xf32>
    %103 = arith.truncf %97 : vector<32x128xf32> to vector<32x128xbf16>
    %104 = arith.truncf %102 : vector<32x128xf32> to vector<32x128xbf16>
    %c0_42 = arith.constant 0 : index
    %c0_43 = arith.constant 0 : index
    %c0_44 = arith.constant 0 : index
    %105 = vector.load %arg8[%c0_42, %c0_43, %c0_44] : memref<3x128x64xbf16, #tpu.memory_space<vmem>>, vector<1x128x64xbf16>
    %106 = vector.shape_cast %105 : vector<1x128x64xbf16> to vector<128x64xbf16>
    %cst_45 = arith.constant dense<0.000000e+00> : vector<32x64xf32>
    %107 = tpu.matmul %103, %106, %cst_45 {dimension_numbers = #tpu.dot_dimension_numbers<[1], [0], [0], [1], [0, 0, 1, 1], [], []>} : vector<32x128xbf16>, vector<128x64xbf16>, vector<32x64xf32> -> vector<32x64xf32>
    %c1_46 = arith.constant 1 : index
    %c0_47 = arith.constant 0 : index
    %c0_48 = arith.constant 0 : index
    %108 = vector.load %arg8[%c1_46, %c0_47, %c0_48] : memref<3x128x64xbf16, #tpu.memory_space<vmem>>, vector<1x128x64xbf16>
    %109 = vector.shape_cast %108 : vector<1x128x64xbf16> to vector<128x64xbf16>
    %cst_49 = arith.constant dense<0.000000e+00> : vector<32x64xf32>
    %110 = tpu.matmul %92, %109, %cst_49 {dimension_numbers = #tpu.dot_dimension_numbers<[1], [0], [0], [1], [0, 0, 1, 1], [], []>} : vector<32x128xbf16>, vector<128x64xbf16>, vector<32x64xf32> -> vector<32x64xf32>
    %111 = arith.addf %107, %110 : vector<32x64xf32>
    %c2_50 = arith.constant 2 : index
    %c0_51 = arith.constant 0 : index
    %c0_52 = arith.constant 0 : index
    %112 = vector.load %arg8[%c2_50, %c0_51, %c0_52] : memref<3x128x64xbf16, #tpu.memory_space<vmem>>, vector<1x128x64xbf16>
    %113 = vector.shape_cast %112 : vector<1x128x64xbf16> to vector<128x64xbf16>
    %cst_53 = arith.constant dense<0.000000e+00> : vector<32x64xf32>
    %114 = tpu.matmul %104, %113, %cst_53 {dimension_numbers = #tpu.dot_dimension_numbers<[1], [0], [0], [1], [0, 0, 1, 1], [], []>} : vector<32x128xbf16>, vector<128x64xbf16>, vector<32x64xf32> -> vector<32x64xf32>
    %115 = arith.addf %111, %114 : vector<32x64xf32>
    %c0_54 = arith.constant 0 : index
    %c0_55 = arith.constant 0 : index
    %116 = vector.load %arg9[%c0_54, %c0_55] : memref<1x64xf32, #tpu.memory_space<vmem>>, vector<1x64xf32>
    %117 = vector.broadcast %116 : vector<1x64xf32> to vector<32x64xf32>
    %118 = arith.addf %115, %117 : vector<32x64xf32>
    %119 = arith.addf %118, %51 : vector<32x64xf32>
    %120 = arith.mulf %119, %119 : vector<32x64xf32>
    %121 = arith.mulf %119, %120 : vector<32x64xf32>
    %cst_56 = arith.constant 4.471500e-02 : f32
    %122 = vector.broadcast %cst_56 : f32 to vector<32x64xf32>
    %123 = arith.mulf %122, %121 : vector<32x64xf32>
    %124 = arith.addf %119, %123 : vector<32x64xf32>
    %cst_57 = arith.constant 0.797884583 : f32
    %125 = vector.broadcast %cst_57 : f32 to vector<32x64xf32>
    %126 = arith.mulf %125, %124 : vector<32x64xf32>
    %127 = math.tanh %126 : vector<32x64xf32>
    %cst_58 = arith.constant 1.000000e+00 : f32
    %128 = vector.broadcast %cst_58 : f32 to vector<32x64xf32>
    %129 = arith.addf %128, %127 : vector<32x64xf32>
    %cst_59 = arith.constant 5.000000e-01 : f32
    %130 = vector.broadcast %cst_59 : f32 to vector<32x64xf32>
    %131 = arith.mulf %130, %129 : vector<32x64xf32>
    %132 = arith.mulf %119, %131 : vector<32x64xf32>
    %133 = arith.truncf %132 : vector<32x64xf32> to vector<32x64xbf16>
    %c0_60 = arith.constant 0 : index
    %c0_61 = arith.constant 0 : index
    %134 = vector.load %arg10[%c0_60, %c0_61] : memref<64x32xbf16, #tpu.memory_space<vmem>>, vector<64x32xbf16>
    %cst_62 = arith.constant dense<0.000000e+00> : vector<32x32xf32>
    %135 = tpu.matmul %133, %134, %cst_62 {dimension_numbers = #tpu.dot_dimension_numbers<[1], [0], [0], [1], [0, 0, 1, 1], [], []>} : vector<32x64xbf16>, vector<64x32xbf16>, vector<32x32xf32> -> vector<32x32xf32>
    %c0_63 = arith.constant 0 : index
    %c0_64 = arith.constant 0 : index
    %136 = vector.load %arg11[%c0_63, %c0_64] : memref<1x32xf32, #tpu.memory_space<vmem>>, vector<1x32xf32>
    %137 = vector.broadcast %136 : vector<1x32xf32> to vector<32x32xf32>
    %138 = arith.addf %135, %137 : vector<32x32xf32>
    %c0_65 = arith.constant 0 : index
    %c0_66 = arith.constant 0 : index
    %139 = vector.load %arg13[%c0_65, %c0_66] : memref<1x32xf32, #tpu.memory_space<vmem>>, vector<1x32xf32>
    %c0_67 = arith.constant 0 : index
    %c0_68 = arith.constant 0 : index
    %140 = vector.load %arg12[%c0_67, %c0_68] : memref<1x32xf32, #tpu.memory_space<vmem>>, vector<1x32xf32>
    %141 = vector.broadcast %140 : vector<1x32xf32> to vector<32x32xf32>
    %142 = arith.mulf %138, %141 : vector<32x32xf32>
    %143 = vector.broadcast %139 : vector<1x32xf32> to vector<32x32xf32>
    %144 = arith.addf %143, %142 : vector<32x32xf32>
    %145 = arith.addf %22, %144 : vector<32x32xf32>
    %146 = arith.truncf %145 : vector<32x32xf32> to vector<32x32xbf16>
    %c0_69 = arith.constant 0 : index
    %c0_70 = arith.constant 0 : index
    %147 = vector.load %arg14[%c0_69, %c0_70] : memref<32x32xbf16, #tpu.memory_space<vmem>>, vector<32x32xbf16>
    tpu.vector_store %arg14[%c0_69, %c0_70], %146 {strides = array<i32>} : memref<32x32xbf16, #tpu.memory_space<vmem>>, vector<32x32xbf16>,
    return
  }
}

</mosaic_0001>

<bundles_post_ra>
// kernel: raiflow_ff_block.1
= control target key start
LH: loop header
LB: loop body
LE: loop exit
PB: predicated region body
PF: predicated region fallthrough
CT: control target
= control target key end

     0   :  { %vm175_vm0 = vcmask 261120   ;;  %vm356_vm3 = vcmask 523264   ;;  %vm1589_vm8 = vmmov 1   ;;  %vm1194_vm13 = vcmask 257024   ;;  %s1976_s4 = inlined_call_operand.vmem [shape: bf16[32,64], index: 4, kind: input, shape index: {}]   ;;  %s1977_s0 = inlined_call_operand.vmem [shape: bf16[32,32], index: 0, kind: input, shape index: {}]   ;;  %s1978_s1 = inlined_call_operand.<no memory space> [shape: f32[1,1], index: 1, kind: input, shape index: {}]   ;;  %s1979_s2 = inlined_call_operand.vmem [shape: f32[1,32], index: 2, kind: input, shape index: {}]   ;;  %s1980_s3 = inlined_call_operand.vmem [shape: f32[1,32], index: 3, kind: input, shape index: {}]   ;;  %s1981_s6 = inlined_call_operand.vmem [shape: bf16[3,64,128], index: 6, kind: input, shape index: {}]   ;;  %s1982_s5 = inlined_call_operand.vmem [shape: f32[1,64], index: 5, kind: input, shape index: {}]   ;;  %s1983_s8 = inlined_call_operand.vmem [shape: bf16[3,128,64], index: 8, kind: input, shape index: {}]   ;;  %s1984_s7 = inlined_call_operand.vmem [shape: f32[1,128], index: 7, kind: input, shape index: {}]   ;;  %s1985_s10 = inlined_call_operand.vmem [shape: bf16[64,32], index: 10, kind: input, shape index: {}]   ;;  %s1986_s9 = inlined_call_operand.vmem [shape: f32[1,64], index: 9, kind: input, shape index: {}]   ;;  %s1987_s11 = inlined_call_operand.vmem [shape: f32[1,32], index: 11, kind: input, shape index: {}]   ;;  %s1988_s12 = inlined_call_operand.vmem [shape: f32[1,32], index: 12, kind: input, shape index: {}]   ;;  %s1989_s13 = inlined_call_operand.vmem [shape: f32[1,32], index: 13, kind: input, shape index: {}]   ;;  %s1990_s14 = inlined_call_operand.vmem [shape: bf16[32,32], index: 14, kind: output, shape index: {}]  }
   0x1   :  { %v1515_v0 = vld [vmem:[%s1976_s4 + $0x8] sm:$0xff]   ;;  %v1516_v1 = vld [vmem:[%s1976_s4] sm:$0xff]   ;;  %v120_v4 = vstv %s1978_s1  ;;  %v1517_v29 = vld [vmem:[%s1981_s6 + $0x38] sm:$0xff]  }
   0x2   :  { %1398 = vmatprep.subr.bf16.mxu0 %v1515_v0  ;;  %v1674_v2 = vld [vmem:[%s1977_s0] sm:$0xff]   ;;  %v1679_v3 = vld [vmem:[%s1977_s0 + $0x8] sm:$0xff]   ;;  %1406 = vmatprep.subr.bf16.mxu1 %v1517_v29  ;;  %v1518_v30 = vld [vmem:[%s1981_s6 + $0x30] sm:$0xff]  }
   0x3   :  { %1399 = vmatpush3.bf16.msra.mxu0 %v1515_v0  ;;  %v1333_v5 = vunpack.c.l.bf16 %v1674_v2  ;;  %v1334_v6 = vunpack.c.h.bf16 %v1674_v2  ;;  %v1337_v7 = vunpack.c.l.bf16 %v1679_v3  ;;  %v1338_v8 = vunpack.c.h.bf16 %v1679_v3  ;;  %v1203_v13 = vld [vmem:[%s1979_s2] ss:$0 sm:$0xff]  ;;  %1407 = vmatpush3.bf16.msra.mxu1 %v1517_v29  ;;  %v1519_v31 = vld [vmem:[%s1981_s6 + $0x18] sm:$0xff]   ;;  %v1520_v32 = vld [vmem:[%s1981_s6 + $0x28] sm:$0xff]  }
   0x4   :  { %1400 = vmatprep.subr.bf16.mxu0 %v1516_v1  ;;  %v1204_v15 = vld [vmem:[%s1980_s3] ss:$0 sm:$0xff]  ;;  %1408 = vmatprep.subr.bf16.mxu1 %v1518_v30  ;;  %v1521_v33 = vld [vmem:[%s1981_s6 + $0x10] sm:$0xff]   ;;  %v1523_v35 = vld [vmem:[%s1981_s6 + $0x8] sm:$0xff]  }
   0x5   :  { %v121_v9 = vmul.f32 %v1333_v5, %v120_v4  ;;  %v122_v10 = vmul.f32 %v1334_v6, %v120_v4  ;;  %v123_v11 = vmul.f32 %v1337_v7, %v120_v4  ;;  %v124_v12 = vmul.f32 %v1338_v8, %v120_v4  ;;  %v1522_v34 = vld [vmem:[%s1981_s6 + $0x20] sm:$0xff]   ;;  %v1729_v37 = vld [vmem:[%s1981_s6 + $0x58] sm:$0xff]  }
   0x6   :  { %v1524_v36 = vld [vmem:[%s1981_s6] sm:$0xff]  }
   0x7   :  { %1401 = vmatpush3.bf16.msra.mxu0 %v1516_v1  ;;  %1557 = vtanh.f32 %v121_v9  ;;  %1409 = vmatpush3.bf16.msra.mxu1 %v1518_v30  ;;  %v1205_v38 = vld [vmem:[%s1982_s5] ss:$0 sm:$0xff]  ;;  %v49_v9 = vlaneseq }
   0x8   :  { %1559 = vtanh.f32 %v122_v10  ;;  %1418 = vmatprep.subr.bf16.mxu0 %v1519_v31  ;;  %1410 = vmatprep.subr.bf16.mxu1 %v1520_v32 }
   0x9   :  { %1561 = vtanh.f32 %v123_v11 }
   0xa   :  { %1563 = vtanh.f32 %v124_v12 }
   0xb   :  { %1411 = vmatpush3.bf16.msra.mxu1 %v1520_v32 }
   0xc   :  { %1412 = vmatprep.subr.bf16.mxu1 %v1522_v34 }
   0xf   :  { %1413 = vmatpush3.bf16.msra.mxu1 %v1522_v34 }
  0x10   :  { %1430 = vmatprep.subr.bf16.mxu1 %v1729_v37 }
  0x14   :  { %v1558_v14 = vpop.eup %1557 }
  0x15   :  { %v1560_v16 = vpop.eup %1559  ;;  %v135_v17 = vmul.f32 %v1558_v14, %v1203_v13 }
  0x16   :  { %v1562_v18 = vpop.eup %1561  ;;  %v136_v19 = vmul.f32 %v1560_v16, %v1203_v13 }
  0x17   :  { %v1564_v20 = vpop.eup %1563  ;;  %v146_v21 = vadd.f32 %v1204_v15, %v135_v17  ;;  %v137_v22 = vmul.f32 %v1562_v18, %v1203_v13 }
  0x18   :  { %v147_v23 = vadd.f32 %v1204_v15, %v136_v19  ;;  %v138_v24 = vmul.f32 %v1564_v20, %v1203_v13  ;;  %v1735_v13 = vshrl.u32 %v49_v9, 7  ;;  %v1529_v9 = vld [vmem:[%s1983_s8 + $0x78] sm:$0xff]  }
  0x19   :  { %v148_v25 = vadd.f32 %v1204_v15, %v137_v22 }
  0x1a   :  { %v150_v26 = vpack.c.bf16 %v147_v23, %v146_v21  ;;  %v149_v27 = vadd.f32 %v1204_v15, %v138_v24  ;;  %v52_v17 = vadd.s32 16, %v1735_v13  ;;  %v51_v18 = vadd.s32 8, %v1735_v13 }
  0x1b   :  { %vm273_vm1 = vcmp.lt.s32.totalorder %v1735_v13, 1  ;;  %vm294_vm6 = vcmp.lt.s32.totalorder %v1735_v13, 7 }
  0x1c   :  { %1402 = vmatprep.mubr.msk.bf16.mxu0 %vm175_vm0, %v150_v26  ;;  %v151_v28 = vpack.c.bf16 %v149_v27, %v148_v25  ;;  %v58_v25 = vand.u32 15, %v1735_v13  ;;  %v72_v27 = vand.u32 15, %v52_v17  ;;  %v1536_v17 = vld [vmem:[%s1983_s8 + $0x58] sm:$0xff]  }
  0x1e   :  { %1403 = vmatmul.mubr.msk.bf16.vlgmr.msra.gmra.mxu0 %vm175_vm0, %v151_v28  ;;  %v65_v28 = vand.u32 15, %v51_v18  ;;  %vm1750_vm2 = vcmp.ne.s32.totalorder %v58_v25, 0  ;;  %vm1757_vm4 = vcmp.ne.s32.totalorder %v72_v27, 0  ;;  %v1537_v18 = vld [vmem:[%s1983_s8 + $0x20] sm:$0xff]   ;;  %v1543_v25 = vld [vmem:[%s1983_s8 + $0x8] sm:$0xff]  }
  0x1f   :  { %1419 = vmatpush3.bf16.msra.mxu0 %v1519_v31  ;;  %v53_v31 = vadd.s32 24, %v1735_v13  ;;  %v1544_v27 = vld [vmem:[%s1983_s8] sm:$0xff]   ;;  %vm1277_vm9 = vmpackc.low %vm1589_vm8, %vm1750_vm2  ;;  %v1555_v13 = vld [vmem:[%s1985_s10 + $0x8] sm:$0xff]  }
  0x20   :  { %1420 = vmatprep.subr.bf16.mxu0 %v1521_v33  ;;  %vm1761_vm5 = vcmp.ne.s32.totalorder %v65_v28, 15  ;;  %v1870_v28 = vld [vmem:[%s1983_s8 + $0xb8] sm:$0xff]   ;;  %vm1280_vm11 = vmpackc.low %vm1589_vm8, %vm1757_vm4 }
  0x21   :  { %vm1307_vm10 = vmpackc.low %vm1761_vm5, %vm1589_vm8 }
  0x23   :  { %1421 = vmatpush3.bf16.msra.mxu0 %v1521_v33 }
  0x24   :  { %1422 = vmatprep.subr.bf16.mxu0 %v1523_v35 }
  0x27   :  { %1423 = vmatpush3.bf16.msra.mxu0 %v1523_v35 }
  0x28   :  { %1424 = vmatprep.subr.bf16.mxu0 %v1524_v36 }
  0x2b   :  { %1425 = vmatpush3.bf16.msra.mxu0 %v1524_v36 }
  0x2c   :  { %1442 = vmatprep.subr.bf16.mxu0 %v1529_v9 }
  0xde   :  { %v1404_v39 = vpop.f32.mrf.mxu0 }
  0xdf   :  { %v225_v40 = vadd.f32 %v1404_v39, %v1205_v38  ;;  %v1547_v39 = vld [vmem:[%s1983_s8 + $0xa8] sm:$0xff]  }
  0xe0   :  { %v216_v41 = vpop.f32.mrf.mxu0 }
  0xe1   :  { %v233_v42 = vmul.f32 %v225_v40, %v225_v40  ;;  %v217_v43 = vadd.f32 %v1205_v38, %v216_v41 }
  0xe2   :  { %v1405_v44 = vpop.f32.mrf.mxu0 }
  0xe3   :  { %v237_v45 = vmul.f32 %v233_v42, %v225_v40  ;;  %v231_v46 = vmul.f32 %v217_v43, %v217_v43  ;;  %v228_v47 = vadd.f32 %v1405_v44, %v1205_v38 }
  0xe4   :  { %v219_v48 = vpop.f32.mrf.mxu0 }
  0xe5   :  { %v241_v49 = vmul.f32 0.044715, %v237_v45  ;;  %v235_v50 = vmul.f32 %v231_v46, %v217_v43  ;;  %v234_v51 = vmul.f32 %v228_v47, %v228_v47  ;;  %v220_v52 = vadd.f32 %v1205_v38, %v219_v48  ;;  %v1526_v46 = vld [vmem:[%s1981_s6 + $0x50] sm:$0xff]   ;;  %v1549_v38 = vld [vmem:[%s1983_s8 + $0x98] sm:$0xff]  }
  0xe7   :  { %v245_v53 = vadd.f32 %v241_v49, %v225_v40  ;;  %v239_v54 = vmul.f32 0.044715, %v235_v50  ;;  %v238_v55 = vmul.f32 %v234_v51, %v228_v47  ;;  %v232_v56 = vmul.f32 %v220_v52, %v220_v52 }
  0xe9   :  { %v249_v57 = vmul.f32 0.7978846, %v245_v53  ;;  %v243_v58 = vadd.f32 %v239_v54, %v217_v43  ;;  %v242_v59 = vmul.f32 0.044715, %v238_v55  ;;  %v236_v60 = vmul.f32 %v232_v56, %v220_v52 }
  0xeb   :  { %1565 = vtanh.f32 %v249_v57  ;;  %v247_v61 = vmul.f32 0.7978846, %v243_v58  ;;  %v246_v62 = vadd.f32 %v242_v59, %v228_v47  ;;  %v240_v63 = vmul.f32 0.044715, %v236_v60  ;;  %v1527_v59 = vld [vmem:[%s1981_s6 + $0x48] sm:$0xff]  }
  0xed   :  { %1567 = vtanh.f32 %v247_v61  ;;  %v250_v0 = vmul.f32 0.7978846, %v246_v62  ;;  %v244_v1 = vadd.f32 %v240_v63, %v220_v52  ;;  %v79_v61 = vand.u32 15, %v53_v31  ;;  %v1556_v62 = vld [vmem:[%s1985_s10] sm:$0xff]  }
  0xef   :  { %1569 = vtanh.f32 %v250_v0  ;;  %v248_v4 = vmul.f32 0.7978846, %v244_v1  ;;  %vm1808_vm7 = vcmp.ne.s32.totalorder %v79_v61, 15 }
  0xf0   :  { %vm1310_vm12 = vmpackc.low %vm1808_vm7, %vm1589_vm8 }
  0xf1   :  { %1571 = vtanh.f32 %v248_v4 }
  0xf8   :  { %v1566_v10 = vpop.eup %1565 }
  0xf9   :  { %v257_v11 = vadd.f32 1.0, %v1566_v10  ;;  %v1530_v10 = vld [vmem:[%s1983_s8 + $0x70] sm:$0xff]  }
  0xfa   :  { %v1568_v12 = vpop.eup %1567 }
  0xfb   :  { %v255_v14 = vadd.f32 1.0, %v1568_v12  ;;  %v261_v16 = vmul.f32 0.5, %v257_v11  ;;  %v1531_v11 = vld [vmem:[%s1983_s8 + $0x38] sm:$0xff]   ;;  %v1532_v12 = vld [vmem:[%s1983_s8 + $0x68] sm:$0xff]  }
  0xfc   :  { %v1570_v15 = vpop.eup %1569 }
  0xfd   :  { %v259_v19 = vmul.f32 0.5, %v255_v14  ;;  %v258_v20 = vadd.f32 1.0, %v1570_v15  ;;  %v1742_v26 = vmul.f32 %v261_v16, %v225_v40  ;;  %v1533_v14 = vld [vmem:[%s1983_s8 + $0x30] sm:$0xff]   ;;  %v1534_v15 = vld [vmem:[%s1983_s8 + $0x60] sm:$0xff]   ;;  %v1535_v16 = vld [vmem:[%s1983_s8 + $0x28] sm:$0xff]  }
  0xfe   :  { %v1572_v21 = vpop.eup %1571 }
  0xff   :  { %v1739_v22 = vmul.f32 %v259_v19, %v217_v43  ;;  %v262_v23 = vmul.f32 0.5, %v258_v20  ;;  %v256_v24 = vadd.f32 1.0, %v1572_v21  ;;  %v271_v36 = vrot.slane %v1742_v26, 7  ;;  %v1538_v19 = vld [vmem:[%s1983_s8 + $0x50] sm:$0xff]   ;;  %v1539_v20 = vld [vmem:[%s1983_s8 + $0x18] sm:$0xff]   ;;  %v1540_v21 = vld [vmem:[%s1983_s8 + $0x48] sm:$0xff]  }
 0x100   :  { %v292_v43 = vrot.slane %v1742_v26, 1 }
 0x101   :  { %v1744_v29 = vmul.f32 %v262_v23, %v228_v47  ;;  %v260_v30 = vmul.f32 0.5, %v256_v24  ;;  %v269_v34 = vrot.slane %v1739_v22, 7  ;;  %v290_v47 = vrot.slane %v1739_v22, 1  ;;  %v1541_v23 = vld [vmem:[%s1983_s8 + $0x10] sm:$0xff]   ;;  %v1542_v24 = vld [vmem:[%s1983_s8 + $0x40] sm:$0xff]  }
 0x103   :  { %v1748_v32 = vmul.f32 %v260_v30, %v220_v52  ;;  %v272_v35 = vrot.slane %v1744_v29, 7  ;;  %v268_v44 = vpack.c.bf16 %v1744_v29, %v1742_v26  ;;  %v293_v60 = vrot.slane %v1744_v29, 1 }
 0x105   :  { %v267_v40 = vpack.c.bf16 %v1748_v32, %v1739_v22  ;;  %v270_v41 = vrot.slane %v1748_v32, 7  ;;  %v277_v42 = vsel %vm273_vm1, %v272_v35, %v269_v34  ;;  %v291_v48 = vrot.slane %v1748_v32, 1 }
 0x106   :  { %v286_v45 = vsel %vm1750_vm2, %v277_v42, 0.0  ;;  %v274_v50 = vsel %vm273_vm1, %v271_v36, %v272_v35  ;;  %v298_v63 = vsel %vm294_vm6, %v293_v60, %v290_v47  ;;  %v295_v0 = vsel %vm294_vm6, %v292_v43, %v293_v60 }
 0x107   :  { %1414 = vmatprep.mubr.msk.bf16.mxu1 %vm356_vm3, %v267_v40  ;;  %v276_v49 = vsel %vm273_vm1, %v269_v34, %v270_v41  ;;  %v275_v51 = vsel %vm273_vm1, %v270_v41, %v271_v36  ;;  %v296_v54 = vsel %vm294_vm6, %v291_v48, %v292_v43  ;;  %v297_v55 = vsel %vm294_vm6, %v290_v47, %v291_v48 }
 0x108   :  { %1415 = vmatmul.mubr.msk.bf16.vlgmr.msra.gmra.mxu1 %vm356_vm3, %v268_v44  ;;  %v311_v52 = vpack.c.bf16 %v276_v49, %v286_v45  ;;  %v288_v53 = vsel %vm1757_vm4, %v275_v51, 0.0  ;;  %v308_v57 = vsel %vm1761_vm5, %v296_v54, 0.0  ;;  %v310_v1 = vsel %vm1808_vm7, %v298_v63, 0.0  ;;  %v1244_v44 = vld [vmem:[%s1984_s7] ss:$0 sm:$0xff] }
 0x109   :  { %1431 = vmatpush3.bf16.msra.mxu1 %v1729_v37  ;;  %v312_v56 = vpack.c.bf16 %v274_v50, %v288_v53  ;;  %v313_v58 = vpack.c.bf16 %v308_v57, %v297_v55  ;;  %v1528_v37 = vld [vmem:[%s1981_s6 + $0x40] sm:$0xff]   ;;  %v314_v4 = vpack.c.bf16 %v310_v1, %v295_v0 }
 0x10a   :  { %1426 = vmatprep.mubr.msk.bf16.mxu0 %vm356_vm3, %v311_v52  ;;  %1432 = vmatprep.subr.bf16.mxu1 %v1526_v46 }
 0x10b   :  { %1427 = vmatmul.mubr.msk.bf16.vlgmr.msra.gmra.mxu0 %vm356_vm3, %v312_v56  ;;  %1438 = vmatprep.mubr.msk.bf16.mxu1 %vm356_vm3, %v313_v58 }
 0x10c   :  { %1443 = vmatpush3.bf16.msra.mxu0 %v1529_v9 }
 0x10d   :  { %1433 = vmatpush3.bf16.msra.mxu1 %v1526_v46  ;;  %1444 = vmatprep.subr.bf16.mxu0 %v1530_v10 }
 0x10e   :  { %1434 = vmatprep.subr.bf16.mxu1 %v1527_v59 }
 0x110   :  { %1445 = vmatpush3.bf16.msra.mxu0 %v1530_v10 }
 0x111   :  { %1435 = vmatpush3.bf16.msra.mxu1 %v1527_v59  ;;  %1446 = vmatprep.subr.bf16.mxu0 %v1532_v12 }
 0x112   :  { %1436 = vmatprep.subr.bf16.mxu1 %v1528_v37 }
 0x114   :  { %1447 = vmatpush3.bf16.msra.mxu0 %v1532_v12 }
 0x115   :  { %1437 = vmatpush3.bf16.msra.mxu1 %v1528_v37  ;;  %1448 = vmatprep.subr.bf16.mxu0 %v1534_v15 }
 0x116   :  { %1462 = vmatprep.subr.bf16.mxu1 %v1531_v11 }
 0x118   :  { %1439 = vmatmul.mubr.msk.bf16.vlgmr.msra.gmra.mxu1 %vm356_vm3, %v314_v4  ;;  %1449 = vmatpush3.bf16.msra.mxu0 %v1534_v15 }
 0x119   :  { %1463 = vmatpush3.bf16.msra.mxu1 %v1531_v11  ;;  %1450 = vmatprep.subr.bf16.mxu0 %v1536_v17 }
 0x11a   :  { %1464 = vmatprep.subr.bf16.mxu1 %v1533_v14 }
 0x11c   :  { %1451 = vmatpush3.bf16.msra.mxu0 %v1536_v17 }
 0x11d   :  { %1465 = vmatpush3.bf16.msra.mxu1 %v1533_v14  ;;  %1452 = vmatprep.subr.bf16.mxu0 %v1538_v19 }
 0x11e   :  { %1466 = vmatprep.subr.bf16.mxu1 %v1535_v16 }
 0x120   :  { %1453 = vmatpush3.bf16.msra.mxu0 %v1538_v19 }
 0x121   :  { %1467 = vmatpush3.bf16.msra.mxu1 %v1535_v16  ;;  %1454 = vmatprep.subr.bf16.mxu0 %v1540_v21 }
 0x122   :  { %1468 = vmatprep.subr.bf16.mxu1 %v1537_v18 }
 0x124   :  { %1455 = vmatpush3.bf16.msra.mxu0 %v1540_v21 }
 0x125   :  { %1469 = vmatpush3.bf16.msra.mxu1 %v1537_v18  ;;  %1456 = vmatprep.subr.bf16.mxu0 %v1542_v24 }
 0x126   :  { %1470 = vmatprep.subr.bf16.mxu1 %v1539_v20 }
 0x128   :  { %1457 = vmatpush3.bf16.msra.mxu0 %v1542_v24 }
 0x129   :  { %1471 = vmatpush3.bf16.msra.mxu1 %v1539_v20  ;;  %1482 = vmatprep.subr.bf16.mxu0 %v1870_v28 }
 0x12a   :  { %1472 = vmatprep.subr.bf16.mxu1 %v1541_v23 }
 0x12d   :  { %1473 = vmatpush3.bf16.msra.mxu1 %v1541_v23 }
 0x12e   :  { %1474 = vmatprep.subr.bf16.mxu1 %v1543_v25 }
 0x131   :  { %1475 = vmatpush3.bf16.msra.mxu1 %v1543_v25 }
 0x132   :  { %1476 = vmatprep.subr.bf16.mxu1 %v1544_v27 }
 0x135   :  { %1477 = vmatpush3.bf16.msra.mxu1 %v1544_v27 }
 0x1c8   :  { %v1416_v30 = vpop.f32.mrf.mxu1 }
 0x1ca   :  { %v397_v31 = vpop.f32.mrf.mxu1 }
 0x1cb   :  { %v1428_v34 = vpop.f32.mrf.mxu0 }
 0x1cc   :  { %v1417_v35 = vpop.f32.mrf.mxu1  ;;  %v485_v42 = vadd.f32 %v1428_v34, %v1416_v30 }
 0x1cd   :  { %v476_v36 = vpop.f32.mrf.mxu0 }
 0x1ce   :  { %v400_v40 = vpop.f32.mrf.mxu1  ;;  %v477_v45 = vadd.f32 %v476_v36, %v397_v31 }
 0x1cf   :  { %v1429_v41 = vpop.f32.mrf.mxu0 }
 0x1d0   :  { %v488_v49 = vadd.f32 %v1429_v41, %v1417_v35 }
 0x1d1   :  { %v479_v47 = vpop.f32.mrf.mxu0 }
 0x1d2   :  { %v480_v53 = vadd.f32 %v479_v47, %v400_v40 }
 0x1d8   :  { %v1440_v43 = vpop.f32.mrf.mxu1 }
 0x1d9   :  { %v581_v46 = vadd.f32 %v1440_v43, %v485_v42 }
 0x1da   :  { %v564_v48 = vpop.f32.mrf.mxu1 }
 0x1db   :  { %v592_v50 = vadd.f32 %v1244_v44, %v581_v46  ;;  %v579_v51 = vadd.f32 %v564_v48, %v477_v45 }
 0x1dc   :  { %v1441_v52 = vpop.f32.mrf.mxu1 }
 0x1dd   :  { %v596_v54 = vmul.f32 %v592_v50, %v592_v50  ;;  %v590_v55 = vadd.f32 %v1244_v44, %v579_v51  ;;  %v582_v56 = vadd.f32 %v1441_v52, %v488_v49 }
 0x1de   :  { %v567_v57 = vpop.f32.mrf.mxu1 }
 0x1df   :  { %v600_v58 = vmul.f32 %v596_v54, %v592_v50  ;;  %v594_v59 = vmul.f32 %v590_v55, %v590_v55  ;;  %v593_v60 = vadd.f32 %v1244_v44, %v582_v56  ;;  %v580_v61 = vadd.f32 %v567_v57, %v480_v53 }
 0x1e1   :  { %v604_v37 = vmul.f32 0.044715, %v600_v58  ;;  %v598_v63 = vmul.f32 %v594_v59, %v590_v55  ;;  %v597_v0 = vmul.f32 %v593_v60, %v593_v60  ;;  %v591_v1 = vadd.f32 %v1244_v44, %v580_v61 }
 0x1e3   :  { %v608_v4 = vadd.f32 %v604_v37, %v592_v50  ;;  %v602_v9 = vmul.f32 0.044715, %v598_v63  ;;  %v601_v10 = vmul.f32 %v597_v0, %v593_v60  ;;  %v595_v11 = vmul.f32 %v591_v1, %v591_v1  ;;  %v1546_v37 = vld [vmem:[%s1983_s8 + $0xb0] sm:$0xff]  }
 0x1e5   :  { %v612_v12 = vmul.f32 0.7978846, %v608_v4  ;;  %v606_v14 = vadd.f32 %v602_v9, %v590_v55  ;;  %v605_v15 = vmul.f32 0.044715, %v601_v10  ;;  %v599_v16 = vmul.f32 %v595_v11, %v591_v1  ;;  %v1548_v4 = vld [vmem:[%s1983_s8 + $0xa0] sm:$0xff]   ;;  %v1551_v9 = vld [vmem:[%s1983_s8 + $0x88] sm:$0xff]  }
 0x1e6   :  { %v1552_v10 = vld [vmem:[%s1983_s8 + $0x80] sm:$0xff]  }
 0x1e7   :  { %1573 = vtanh.f32 %v612_v12  ;;  %v610_v17 = vmul.f32 0.7978846, %v606_v14  ;;  %v609_v18 = vadd.f32 %v605_v15, %v593_v60  ;;  %v603_v19 = vmul.f32 0.044715, %v599_v16  ;;  %v1553_v16 = vld [vmem:[%s1985_s10 + $0x18] sm:$0xff]  }
 0x1e8   :  { %1502 = vmatprep.subr.bf16.mxu1 %v1553_v16 }
 0x1e9   :  { %1575 = vtanh.f32 %v610_v17  ;;  %v613_v20 = vmul.f32 0.7978846, %v609_v18  ;;  %v607_v21 = vadd.f32 %v603_v19, %v591_v1  ;;  %v1554_v17 = vld [vmem:[%s1985_s10 + $0x10] sm:$0xff]  }
 0x1eb   :  { %1577 = vtanh.f32 %v613_v20  ;;  %v611_v23 = vmul.f32 0.7978846, %v607_v21 }
 0x1ed   :  { %1579 = vtanh.f32 %v611_v23 }
 0x1f4   :  { %v1574_v24 = vpop.eup %1573 }
 0x1f5   :  { %v620_v25 = vadd.f32 1.0, %v1574_v24 }
 0x1f6   :  { %v1576_v27 = vpop.eup %1575 }
 0x1f7   :  { %v618_v30 = vadd.f32 1.0, %v1576_v27  ;;  %v624_v34 = vmul.f32 0.5, %v620_v25 }
 0x1f8   :  { %v1578_v31 = vpop.eup %1577 }
 0x1f9   :  { %v621_v35 = vadd.f32 1.0, %v1578_v31  ;;  %v622_v36 = vmul.f32 0.5, %v618_v30  ;;  %v628_v43 = vmul.f32 %v624_v34, %v592_v50  ;;  %v1313_v31 = vld [vmem:[%s1986_s9] ss:$0 sm:$0xff] }
 0x1fa   :  { %v1580_v40 = vpop.eup %1579 }
 0x1fb   :  { %v625_v41 = vmul.f32 0.5, %v621_v35  ;;  %v619_v42 = vadd.f32 1.0, %v1580_v40  ;;  %v626_v44 = vmul.f32 %v622_v36, %v590_v55  ;;  %v634_v49 = vrot.slane %v628_v43, 7 }
 0x1fc   :  { %v646_v52 = vrot.slane %v628_v43, 1 }
 0x1fd   :  { %v629_v45 = vmul.f32 %v625_v41, %v593_v60  ;;  %v623_v46 = vmul.f32 0.5, %v619_v42  ;;  %v632_v51 = vrot.slane %v626_v44, 7  ;;  %v644_v56 = vrot.slane %v626_v44, 1 }
 0x1ff   :  { %v627_v47 = vmul.f32 %v623_v46, %v591_v1  ;;  %v635_v48 = vrot.slane %v629_v45, 7  ;;  %v631_v58 = vpack.c.bf16 %v629_v45, %v628_v43  ;;  %v647_v11 = vrot.slane %v629_v45, 1 }
 0x201   :  { %v630_v53 = vpack.c.bf16 %v627_v47, %v626_v44  ;;  %v633_v54 = vrot.slane %v627_v47, 7  ;;  %v645_v57 = vrot.slane %v627_v47, 1  ;;  %v639_v59 = vsel %vm273_vm1, %v635_v48, %v632_v51 }
 0x202   :  { %v636_v50 = vsel %vm273_vm1, %v634_v49, %v635_v48  ;;  %v648_v12 = vsel %vm294_vm6, %v646_v52, %v647_v11  ;;  %v651_v14 = vsel %vm294_vm6, %v647_v11, %v644_v56 }
 0x203   :  { %1458 = vmatprep.mubr.bf16.mxu0 %v630_v53  ;;  %v638_v55 = vsel %vm273_vm1, %v632_v51, %v633_v54  ;;  %v649_v60 = vsel %vm294_vm6, %v645_v57, %v646_v52  ;;  %v650_v61 = vsel %vm294_vm6, %v644_v56, %v645_v57  ;;  %v637_v33 = vsel %vm273_vm1, %v633_v54, %v634_v49 }
 0x204   :  { %1459 = vmatmul.mubr.bf16.vlgmr.msra.gmra.mxu0 %v631_v58  ;;  %v1278_v63 = vpack.c.bf16 %v638_v55, %v639_v59  ;;  %v1308_v0 = vpack.c.bf16 %v649_v60, %v650_v61  ;;  %v1281_v1 = vpack.c.bf16 %v636_v50, %v637_v33  ;;  %v1311_v15 = vpack.c.bf16 %v651_v14, %v648_v12 }
 0x205   :  { %1483 = vmatpush3.bf16.msra.mxu0 %v1870_v28  ;;  %v1550_v28 = vld [vmem:[%s1983_s8 + $0x90] sm:$0xff]  }
 0x206   :  { %1478 = vmatprep.mubr.msk.bf16.mxu1 %vm1277_vm9, %v1278_v63  ;;  %1498 = vmatprep.mubr.msk.bf16.mxu0 %vm1307_vm10, %v1308_v0 }
 0x207   :  { %1479 = vmatmul.mubr.msk.bf16.vlgmr.msra.gmra.mxu1 %vm1280_vm11, %v1281_v1  ;;  %1484 = vmatprep.subr.bf16.mxu0 %v1546_v37 }
 0x208   :  { %1503 = vmatpush3.bf16.msra.mxu1 %v1553_v16 }
 0x209   :  { %1485 = vmatpush3.bf16.msra.mxu0 %v1546_v37  ;;  %1504 = vmatprep.subr.bf16.mxu1 %v1554_v17 }
 0x20a   :  { %1486 = vmatprep.subr.bf16.mxu0 %v1547_v39 }
 0x20c   :  { %1505 = vmatpush3.bf16.msra.mxu1 %v1554_v17 }
 0x20d   :  { %1487 = vmatpush3.bf16.msra.mxu0 %v1547_v39  ;;  %1506 = vmatprep.subr.bf16.mxu1 %v1555_v13 }
 0x20e   :  { %1488 = vmatprep.subr.bf16.mxu0 %v1548_v4 }
 0x210   :  { %1507 = vmatpush3.bf16.msra.mxu1 %v1555_v13 }
 0x211   :  { %1489 = vmatpush3.bf16.msra.mxu0 %v1548_v4  ;;  %1508 = vmatprep.subr.bf16.mxu1 %v1556_v62 }
 0x212   :  { %1490 = vmatprep.subr.bf16.mxu0 %v1549_v38 }
 0x214   :  { %1509 = vmatpush3.bf16.msra.mxu1 %v1556_v62 }
 0x215   :  { %1491 = vmatpush3.bf16.msra.mxu0 %v1549_v38 }
 0x216   :  { %1492 = vmatprep.subr.bf16.mxu0 %v1550_v28 }
 0x219   :  { %1493 = vmatpush3.bf16.msra.mxu0 %v1550_v28 }
 0x21a   :  { %1494 = vmatprep.subr.bf16.mxu0 %v1551_v9 }
 0x21d   :  { %1495 = vmatpush3.bf16.msra.mxu0 %v1551_v9 }
 0x21e   :  { %1496 = vmatprep.subr.bf16.mxu0 %v1552_v10 }
 0x221   :  { %1497 = vmatpush3.bf16.msra.mxu0 %v1552_v10 }
 0x224   :  { %1499 = vmatmul.mubr.msk.bf16.vlgmr.msra.gmra.mxu0 %vm1310_vm12, %v1311_v15 }
 0x2c4   :  { %v1460_v18 = vpop.f32.mrf.mxu0 }
 0x2c6   :  { %v775_v19 = vpop.f32.mrf.mxu0 }
 0x2c7   :  { %v1480_v20 = vpop.f32.mrf.mxu1 }
 0x2c8   :  { %v1461_v21 = vpop.f32.mrf.mxu0  ;;  %v881_v27 = vadd.f32 %v1480_v20, %v1460_v18 }
 0x2c9   :  { %v872_v23 = vpop.f32.mrf.mxu1 }
 0x2ca   :  { %v778_v24 = vpop.f32.mrf.mxu0  ;;  %v873_v34 = vadd.f32 %v872_v23, %v775_v19 }
 0x2cb   :  { %v1481_v25 = vpop.f32.mrf.mxu1 }
 0x2cc   :  { %v884_v41 = vadd.f32 %v1481_v25, %v1461_v21 }
 0x2cd   :  { %v875_v36 = vpop.f32.mrf.mxu1 }
 0x2ce   :  { %v876_v45 = vadd.f32 %v875_v36, %v778_v24 }
 0x2e4   :  { %v1500_v30 = vpop.f32.mrf.mxu0 }
 0x2e5   :  { %v1003_v35 = vadd.f32 %v1500_v30, %v881_v27 }
 0x2e6   :  { %v986_v40 = vpop.f32.mrf.mxu0 }
 0x2e7   :  { %v1014_v42 = vadd.f32 %v1313_v31, %v1003_v35  ;;  %v1001_v43 = vadd.f32 %v986_v40, %v873_v34  ;;  %v1321_v35 = vld [vmem:[%s1988_s12] ss:$0 sm:$0xff] }
 0x2e8   :  { %v1501_v44 = vpop.f32.mrf.mxu0  ;;  %v1322_v40 = vld [vmem:[%s1989_s13] ss:$0 sm:$0xff] }
 0x2e9   :  { %v1018_v46 = vadd.f32 %v1014_v42, %v1742_v26  ;;  %v1012_v47 = vadd.f32 %v1313_v31, %v1001_v43  ;;  %v1004_v48 = vadd.f32 %v1501_v44, %v884_v41 }
 0x2ea   :  { %v989_v49 = vpop.f32.mrf.mxu0 }
 0x2eb   :  { %v1022_v51 = vmul.f32 %v1018_v46, %v1018_v46  ;;  %v1016_v52 = vadd.f32 %v1012_v47, %v1739_v22  ;;  %v1015_v53 = vadd.f32 %v1313_v31, %v1004_v48  ;;  %v1002_v54 = vadd.f32 %v989_v49, %v876_v45 }
 0x2ed   :  { %v1026_v56 = vmul.f32 %v1022_v51, %v1018_v46  ;;  %v1020_v57 = vmul.f32 %v1016_v52, %v1016_v52  ;;  %v1019_v58 = vadd.f32 %v1015_v53, %v1744_v29  ;;  %v1013_v59 = vadd.f32 %v1313_v31, %v1002_v54  ;;  %v1314_v31 = vld [vmem:[%s1987_s11] ss:$0 sm:$0xff] }
 0x2ef   :  { %v1030_v50 = vmul.f32 0.044715, %v1026_v56  ;;  %v1024_v55 = vmul.f32 %v1020_v57, %v1016_v52  ;;  %v1023_v60 = vmul.f32 %v1019_v58, %v1019_v58  ;;  %v1017_v61 = vadd.f32 %v1013_v59, %v1748_v32 }
 0x2f1   :  { %v1034_v33 = vadd.f32 %v1030_v50, %v1018_v46  ;;  %v1028_v26 = vmul.f32 0.044715, %v1024_v55  ;;  %v1027_v37 = vmul.f32 %v1023_v60, %v1019_v58  ;;  %v1021_v63 = vmul.f32 %v1017_v61, %v1017_v61 }
 0x2f3   :  { %v1038_v0 = vmul.f32 0.7978846, %v1034_v33  ;;  %v1032_v1 = vadd.f32 %v1028_v26, %v1016_v52  ;;  %v1031_v39 = vmul.f32 0.044715, %v1027_v37  ;;  %v1025_v22 = vmul.f32 %v1021_v63, %v1017_v61 }
 0x2f5   :  { %v1036_v4 = vmul.f32 0.7978846, %v1032_v1  ;;  %v1035_v38 = vadd.f32 %v1031_v39, %v1019_v58  ;;  %v1029_v28 = vmul.f32 0.044715, %v1025_v22  ;;  %1581 = vtanh.f32 %v1038_v0 }
 0x2f7   :  { %1583 = vtanh.f32 %v1036_v4  ;;  %v1039_v29 = vmul.f32 0.7978846, %v1035_v38  ;;  %v1033_v9 = vadd.f32 %v1029_v28, %v1017_v61 }
 0x2f9   :  { %1585 = vtanh.f32 %v1039_v29  ;;  %v1037_v10 = vmul.f32 0.7978846, %v1033_v9 }
 0x2fb   :  { %1587 = vtanh.f32 %v1037_v10 }
 0x302   :  { %v1582_v11 = vpop.eup %1581 }
 0x303   :  { %v1046_v15 = vadd.f32 1.0, %v1582_v11 }
 0x304   :  { %v1584_v32 = vpop.eup %1583 }
 0x305   :  { %v1044_v12 = vadd.f32 1.0, %v1584_v32  ;;  %v1050_v19 = vmul.f32 0.5, %v1046_v15 }
 0x306   :  { %v1586_v14 = vpop.eup %1585 }
 0x307   :  { %v1047_v16 = vadd.f32 1.0, %v1586_v14  ;;  %v1048_v18 = vmul.f32 0.5, %v1044_v12  ;;  %v1054_v25 = vmul.f32 %v1050_v19, %v1018_v46 }
 0x308   :  { %v1588_v17 = vpop.eup %1587 }
 0x309   :  { %v1051_v13 = vmul.f32 0.5, %v1047_v16  ;;  %v1045_v62 = vadd.f32 1.0, %v1588_v17  ;;  %v1052_v23 = vmul.f32 %v1048_v18, %v1016_v52 }
 0x30b   :  { %v1049_v20 = vmul.f32 0.5, %v1045_v62  ;;  %v1055_v21 = vmul.f32 %v1051_v13, %v1019_v58 }
 0x30d   :  { %v1053_v24 = vmul.f32 %v1049_v20, %v1017_v61  ;;  %v1057_v30 = vpack.c.bf16 %v1055_v21, %v1054_v25 }
 0x30f   :  { %v1056_v27 = vpack.c.bf16 %v1053_v24, %v1052_v23 }
 0x311   :  { %1510 = vmatprep.mubr.msk.bf16.mxu1 %vm356_vm3, %v1056_v27 }
 0x312   :  { %1511 = vmatmul.mubr.msk.bf16.vlgmr.msra.gmra.mxu1 %vm356_vm3, %v1057_v30 }
 0x3d2   :  { %v1512_v34 = vpop.f32.mrf.mxu1 }
 0x3d3   :  { %v1146_v36 = vadd.f32 %v1512_v34, %v1314_v31 }
 0x3d4   :  { %v1137_v41 = vpop.f32.mrf.mxu1 }
 0x3d5   :  { %v1162_v42 = vmul.f32 %v1321_v35, %v1146_v36  ;;  %v1138_v43 = vadd.f32 %v1314_v31, %v1137_v41 }
 0x3d6   :  { %v1513_v44 = vpop.f32.mrf.mxu1 }
 0x3d7   :  { %v1172_v45 = vadd.f32 %v1322_v40, %v1162_v42  ;;  %v1160_v46 = vmul.f32 %v1321_v35, %v1138_v43  ;;  %v1149_v47 = vadd.f32 %v1513_v44, %v1314_v31 }
 0x3d8   :  { %v1140_v48 = vpop.f32.mrf.mxu1 }
 0x3d9   :  { %v1176_v49 = vadd.f32 %v1337_v7, %v1172_v45  ;;  %v1170_v51 = vadd.f32 %v1322_v40, %v1160_v46  ;;  %v1163_v52 = vmul.f32 %v1321_v35, %v1149_v47  ;;  %v1141_v53 = vadd.f32 %v1314_v31, %v1140_v48 }
 0x3db   :  { %v1329_v54 = vpack.c.bf16 %v1176_v49, %v1176_v49  ;;  %v1174_v56 = vadd.f32 %v1333_v5, %v1170_v51  ;;  %v1173_v57 = vadd.f32 %v1322_v40, %v1163_v52  ;;  %v1161_v58 = vmul.f32 %v1321_v35, %v1141_v53 }
 0x3dd   :  { %1197 = vst.msk [vmem:[%s1990_s14 + $0x8] sm:$0xf] %vm1194_vm13, %v1329_v54  ;;  %v1327_v59 = vpack.c.bf16 %v1174_v56, %v1174_v56  ;;  %v1177_v50 = vadd.f32 %v1338_v8, %v1173_v57  ;;  %v1171_v55 = vadd.f32 %v1322_v40, %v1161_v58 }
 0x3df   :  { %1195 = vst.msk [vmem:[%s1990_s14] sm:$0xf] %vm1194_vm13, %v1327_v59  ;;  %v1330_v7 = vpack.c.bf16 %v1177_v50, %v1177_v50  ;;  %v1175_v60 = vadd.f32 %v1334_v6, %v1171_v55 }
 0x3e1   :  { %1198 = vst.msk [vmem:[%s1990_s14 + $0xc] sm:$0xf] %vm1194_vm13, %v1330_v7  ;;  %v1328_v5 = vpack.c.bf16 %v1175_v60, %v1175_v60 }
 0x3e3   :  { %1196 = vst.msk [vmem:[%s1990_s14 + $0x4] sm:$0xf] %vm1194_vm13, %v1328_v5 }

</bundles_post_ra>
